<compile_context>
chip_gen: v6e
topology: v6e:2x2x1
jax: 0.10.0
libtpu: 0.0.40
codegen_flags: <defaults>
</compile_context>

<pallas_src>
import functools

import jax
import jax.numpy as jnp
from jax.experimental import pallas as pl
from jax.experimental.pallas import tpu as pltpu


def _round_up(x, m):
    return (x + m - 1) // m * m


# ----------------------------- shared helpers ------------------------------ #
def _layernorm(x, gamma, beta, d_true, eps=1e-5):
    """LayerNorm over the last dim; padded columns (>= d_true) are exactly zero
    in x/gamma/beta and are excluded from the statistics."""
    dp = x.shape[-1]
    mu = jnp.sum(x, axis=-1, keepdims=True) * (1.0 / d_true)
    d = x - mu
    if dp != d_true:                       # static branch (only when padded)
        mask = jax.lax.broadcasted_iota(jnp.int32, x.shape, x.ndim - 1) < d_true
        d = jnp.where(mask, d, 0.0)
    var = jnp.sum(d * d, axis=-1, keepdims=True) * (1.0 / d_true)
    return d * jax.lax.rsqrt(var + eps) * gamma + beta


def _const_idx(n):
    def idx(b, q, l):
        return (0,) * n
    return idx


def _layer_idx(n):
    def idx(b, q, l):
        return (l,) + (0,) * n
    return idx


def _spec(block_shape, index_map, n_buf=None):
    """BlockSpec, optionally with deeper pipelining (streaming fallback path)."""
    if n_buf is not None:
        try:
            return pl.BlockSpec(block_shape, index_map,
                                pipeline_mode=pl.Buffered(n_buf))
        except Exception:
            pass
    return pl.BlockSpec(block_shape, index_map)


# ------------------------- prologue: per-layer K / V ----------------------- #
def _kv_proj_kernel(kv_ref, g1_ref, b1_ref, wk_ref, wv_ref, k_ref, v_ref, *,
                    d_model):
    kvn = _layernorm(kv_ref[...].astype(jnp.float32), g1_ref[...], b1_ref[...],
                     d_model).astype(jnp.bfloat16)
    k_ref[...] = jnp.dot(kvn, wk_ref[...],
                         preferred_element_type=jnp.float32).astype(jnp.bfloat16)
    v_ref[...] = jnp.dot(kvn, wv_ref[...],
                         preferred_element_type=jnp.float32).astype(jnp.bfloat16)


def _project_kv(kv_p, stacked, B, Nk, Dp, IP, depth, d_model, vmem_cap):
    # TODO(synk): tile Nk here (and in the main kernel) for very large contexts.
    est = (2 * (Nk * Dp * 4 + 2 * Dp * IP * 2 + 2 * Nk * IP * 2)   # pipeline bufs
           + Nk * Dp * 4 + 2 * Nk * IP * 4)                        # f32 temporaries
    vmem = int(min(vmem_cap, max(int(1.5 * est) + (4 << 20), 32 << 20)))
    kernel = functools.partial(_kv_proj_kernel, d_model=d_model)
    k_all, v_all = pl.pallas_call(
        kernel,
        out_shape=(jax.ShapeDtypeStruct((depth, B, Nk, IP), jnp.bfloat16),
                   jax.ShapeDtypeStruct((depth, B, Nk, IP), jnp.bfloat16)),
        grid_spec=pltpu.PrefetchScalarGridSpec(
            num_scalar_prefetch=0,
            grid=(depth, B),
            in_specs=[
                pl.BlockSpec((None, Nk, Dp), lambda l, b: (b, 0, 0)),   # key_value
                pl.BlockSpec((None, 1, Dp), lambda l, b: (l, 0, 0)),    # ln1 gamma
                pl.BlockSpec((None, 1, Dp), lambda l, b: (l, 0, 0)),    # ln1 beta
                pl.BlockSpec((None, Dp, IP), lambda l, b: (l, 0, 0)),   # Wk
                pl.BlockSpec((None, Dp, IP), lambda l, b: (l, 0, 0)),   # Wv
            ],
            out_specs=[
                pl.BlockSpec((None, None, Nk, IP), lambda l, b: (l, b, 0, 0)),
                pl.BlockSpec((None, None, Nk, IP), lambda l, b: (l, b, 0, 0)),
            ],
        ),
        compiler_params=pltpu.CompilerParams(
            dimension_semantics=("parallel", "parallel"),
            vmem_limit_bytes=vmem),
    )(kv_p, stacked["g1"], stacked["b1"], stacked["wk"], stacked["wv"])
    # Flatten (depth, B) -> depth*B so the main kernel uses a single dynamic
    # leading index.
    return (k_all.reshape(depth * B, Nk, IP), v_all.reshape(depth * B, Nk, IP))


# ------------------------------ main kernel -------------------------------- #
def _layers_kernel(x_ref, k_ref, v_ref, g1_ref, b1_ref, wq_ref, g2_ref, b2_ref,
                   w1_ref, bb1_ref, w2_ref, bb2_ref, *rest,
                   heads, dhp, d_model, batches, resident, use_scatter):
    if use_scatter:
        scat_ref = rest[0]
        rest = rest[1:]
    o_ref, x_acc, attn_sc = rest

    b = pl.program_id(0)
    layer = pl.program_id(2)

    def w(ref):                      # per-layer weight view
        return ref[layer] if resident else ref[...]

    def kvw(ref):                    # per-(layer, batch) K / V view
        return ref[layer * batches + b] if resident else ref[...]

    @pl.when(layer == 0)
    def _():
        x_acc[...] = x_ref[...]       # load the fresh activation for this q-tile

    x = x_acc[...]                                          # (TQ, Dp) f32
    xn = _layernorm(x, w(g1_ref), w(b1_ref), d_model).astype(jnp.bfloat16)

    # Fused (all heads) query projection; 1/sqrt(dim_head) folded into Wq.
    q_all = jnp.dot(xn, w(wq_ref),
                    preferred_element_type=jnp.float32).astype(jnp.bfloat16)
    k_all = kvw(k_ref)                                       # (Nk, heads*dhp) bf16
    v_all = kvw(v_ref)

    for h in range(heads):            # heads is small & static -> unrolled
        lo, hi = h * dhp, (h + 1) * dhp                      # lane-aligned slices
        q_h = q_all[:, lo:hi]
        k_h = k_all[:, lo:hi]
        v_h = v_all[:, lo:hi]
        # TODO(synk): for large Nk, switch to a flash-style online-softmax loop
        # over Nk chunks instead of materializing full (TQ, Nk) f32 scores.
        s = jax.lax.dot_general(q_h, k_h, (((1,), (1,)), ((), ())),
                                preferred_element_type=jnp.float32)   # (TQ, Nk)
        m = jnp.max(s, axis=-1, keepdims=True)
        e = jnp.exp(s - m)
        inv = pl.reciprocal(jnp.sum(e, axis=-1, keepdims=True), approx=True)
        p = (e * inv).astype(jnp.bfloat16)
        out_h = jnp.dot(p, v_h, preferred_element_type=jnp.float32)   # (TQ, dhp)
        attn_sc[:, lo:hi] = out_h     # lane-aligned store into scratch (no concat)

    if use_scatter:
        # dim_head % 128 != 0: one wide bf16 repack matmul (f32 accumulate).
        attn_out = jnp.dot(attn_sc[...].astype(jnp.bfloat16), scat_ref[...],
                           preferred_element_type=jnp.float32)
    else:
        attn_out = attn_sc[...]

    x1 = attn_out + x                                        # residual 1 (f32)

    # PreNorm + FeedForward (Linear -> exact GELU -> Linear), residual 2.
    xn2 = _layernorm(x1, w(g2_ref), w(b2_ref), d_model).astype(jnp.bfloat16)
    h1 = jnp.dot(xn2, w(w1_ref), preferred_element_type=jnp.float32) + w(bb1_ref)
    # Exact erf GELU to match torch.nn.GELU; approximate=True is a possible
    # v5e speedup but changes numerics, so it is not taken here.
    h1 = jax.nn.gelu(h1, approximate=False).astype(jnp.bfloat16)
    ff = jnp.dot(h1, w(w2_ref), preferred_element_type=jnp.float32) + w(bb2_ref)
    x_new = ff + x1

    x_acc[...] = x_new                # carry activation to the next layer

    @pl.when(layer == pl.num_programs(2) - 1)
    def _():
        o_ref[...] = x_new.astype(o_ref.dtype)


# ------------------------------ param prep --------------------------------- #
def _prep_layer(p, heads, dim_head, Dp, Mp, dhp):
    """Pad + reshape one layer's params: heads-fused QKV weights (bf16, scale
    folded into Wq), bf16 FFN weights, f32 norms/biases."""
    D, inner = p["wq"].shape
    scale = dim_head ** (-0.5)
    wq = p["wq"] * scale
    wk = p["wkv"][:, :inner]
    wv = p["wkv"][:, inner:]

    def fuse_heads(w):                 # (D, inner) -> (Dp, heads*dhp)
        w = w.reshape(D, heads, dim_head)
        w = jnp.pad(w, ((0, Dp - D), (0, 0), (0, dhp - dim_head)))
        return w.reshape(Dp, heads * dhp).astype(jnp.bfloat16)

    def pad2(w, r, c):
        return jnp.pad(w, ((0, r - w.shape[0]), (0, c - w.shape[1])))

    return dict(
        g1=pad2(p["g1"], 1, Dp), b1=pad2(p["b1"], 1, Dp),
        g2=pad2(p["g2"], 1, Dp), b2=pad2(p["b2"], 1, Dp),
        wq=fuse_heads(wq), wk=fuse_heads(wk), wv=fuse_heads(wv),
        w1=pad2(p["w1"], Dp, Mp).astype(jnp.bfloat16),
        bb1=pad2(p["bb1"], 1, Mp),
        w2=pad2(p["w2"], Mp, Dp).astype(jnp.bfloat16),
        bb2=pad2(p["bb2"], 1, Dp),
    )


def _make_scatter(heads, dim_head, dhp, Dp):
    """(heads*dhp, Dp) 0/1 matrix mapping padded head chunks to model columns."""
    scat = jnp.zeros((heads, dhp, Dp), jnp.float32)
    eye = jnp.eye(dim_head, dtype=jnp.float32)
    for h in range(heads):
        scat = scat.at[h, :dim_head, h * dim_head:(h + 1) * dim_head].set(eye)
    return scat.reshape(heads * dhp, Dp).astype(jnp.bfloat16)


# -------------------------------- wrapper ---------------------------------- #
def transformer_forward(x, key_value, params, heads, dim_head, q_tile=256):
    B, Nq, D = x.shape
    Nk = key_value.shape[1]
    depth = len(params)
    inner = heads * dim_head
    assert inner == D, "residual in Transformer requires heads*dim_head == dim"
    mlp = params[0]["w1"].shape[1]

    Dp = _round_up(D, 128)
    Mp = _round_up(mlp, 128)
    dhp = _round_up(dim_head, 128)
    IP = heads * dhp
    use_scatter = (dim_head % 128) != 0

    # Query tiling: multiples of 16 (bf16 output sublane packing); default 256
    # rows fills the 256-row MXU on v6e/v7x.
    q_tile = max(16, (q_tile // 16) * 16)
    tq = min(_round_up(Nq, 16), q_tile)
    n_tiles = _round_up(Nq, tq) // tq
    if B * n_tiles < 2 and Nq > 16:
        # v7x has 2 TensorCores; make sure the parallel grid axes have >= 2 steps.
        tq = max(16, _round_up((Nq + 1) // 2, 16))
    Nq_p = _round_up(Nq, tq)

    x_p = jnp.pad(x.astype(jnp.float32), ((0, 0), (0, Nq_p - Nq), (0, Dp - D)))
    kv_p = jnp.pad(key_value.astype(jnp.float32), ((0, 0), (0, 0), (0, Dp - D)))

    prepped = [_prep_layer(p, heads, dim_head, Dp, Mp, dhp) for p in params]
    stacked = {k: jnp.stack([q[k] for q in prepped]) for k in prepped[0]}

    # ------------------ VMEM budget & residency decision ------------------ #
    try:
        physical = int(pltpu.get_tpu_info().vmem_capacity_bytes)
    except Exception:
        physical = 64 << 20               # v7x per-TensorCore VMEM (smallest)
    cap = min(physical * 3 // 4, 100 << 20)   # <=48 MiB v7x, ~96 MiB v5e/v6e

    w_layer = ((Dp * IP + Dp * Mp + Mp * Dp) * 2      # bf16 matmul weights
               + (5 * Dp + Mp) * 4)                    # f32 norms + biases
    kv_blk = 2 * Nk * IP * 2                           # K + V bf16 per (layer, b)
    scat_bytes = IP * Dp * 2 if use_scatter else 0
    resident_bytes = depth * w_layer + depth * B * kv_blk + scat_bytes

    act_bytes = (2 * tq * Dp * 4 + 2 * tq * Dp * 2     # x / out pipeline buffers
                 + tq * Dp * 4 + tq * IP * 4           # x_acc / attn_sc scratch
                 + tq * IP * 6                         # q_all (f32 + bf16)
                 + 3 * tq * Nk * 4                     # scores/exp/probs (1 head)
                 + tq * Mp * 6                         # GELU intermediate
                 + 6 * tq * Dp * 4)                    # xn/xn2/x1/attn_out/ff/x_new

    resident = (2 * resident_bytes + act_bytes) <= physical // 2
    if resident:
        n_buf = None
        vmem_est = 2 * resident_bytes + act_bytes
    else:
        n_buf = 3                                      # deeper streaming buffers
        vmem_est = n_buf * (w_layer + kv_blk) + 2 * scat_bytes + act_bytes
    vmem_limit = int(min(cap, max(int(1.3 * vmem_est) + (4 << 20), 32 << 20)))

    # ------------- prologue: per-(layer, batch) K / V in bf16 ------------- #
    k_all, v_all = _project_kv(kv_p, stacked, B, Nk, Dp, IP, depth, D, cap)

    # -------------------------- main layer kernel ------------------------- #
    def wspec(shape, deep=False):
        if resident:
            return pl.BlockSpec((depth,) + shape, _const_idx(1 + len(shape)))
        return _spec((None,) + shape, _layer_idx(len(shape)),
                     n_buf if deep else None)

    def kvspec():
        if resident:
            return pl.BlockSpec((depth * B, Nk, IP), _const_idx(3))
        return _spec((None, Nk, IP), lambda b, q, l: (l * B + b, 0, 0), n_buf)

    in_specs = [
        pl.BlockSpec((None, tq, Dp), lambda b, q, l: (b, q, 0)),   # x
        kvspec(), kvspec(),                                        # K, V
        wspec((1, Dp)), wspec((1, Dp)),                            # ln1 gamma/beta
        wspec((Dp, IP), deep=True),                                # Wq (heads fused)
        wspec((1, Dp)), wspec((1, Dp)),                            # ln2 gamma/beta
        wspec((Dp, Mp), deep=True), wspec((1, Mp)),                # W1, b1
        wspec((Mp, Dp), deep=True), wspec((1, Dp)),                # W2, b2
    ]
    inputs = [x_p, k_all, v_all,
              stacked["g1"], stacked["b1"], stacked["wq"],
              stacked["g2"], stacked["b2"],
              stacked["w1"], stacked["bb1"], stacked["w2"], stacked["bb2"]]
    if use_scatter:
        in_specs.append(pl.BlockSpec((IP, Dp), lambda b, q, l: (0, 0)))
        inputs.append(_make_scatter(heads, dim_head, dhp, Dp))

    kernel = functools.partial(_layers_kernel, heads=heads, dhp=dhp, d_model=D,
                               batches=B, resident=resident,
                               use_scatter=use_scatter)

    out = pl.pallas_call(
        kernel,
        out_shape=jax.ShapeDtypeStruct((B, Nq_p, Dp), jnp.bfloat16),
        grid_spec=pltpu.PrefetchScalarGridSpec(
            num_scalar_prefetch=0,
            grid=(B, Nq_p // tq, depth),
            in_specs=in_specs,
            out_specs=pl.BlockSpec((None, tq, Dp), lambda b, q, l: (b, q, 0)),
            scratch_shapes=[pltpu.VMEM((tq, Dp), jnp.float32),     # activation
                            pltpu.VMEM((tq, IP), jnp.float32)],    # head outputs
        ),
        compiler_params=pltpu.CompilerParams(
            dimension_semantics=("parallel", "parallel", "arbitrary"),
            vmem_limit_bytes=vmem_limit),
    )(*inputs)

    return out[:, :Nq, :D].astype(x.dtype)


# ---------------- pure-JAX f32 reference for validation -------------------- #
def _ln_ref(x, gamma, beta, eps=1e-5):
    mu = jnp.mean(x, axis=-1, keepdims=True)
    var = jnp.mean((x - mu) ** 2, axis=-1, keepdims=True)
    return (x - mu) * jax.lax.rsqrt(var + eps) * gamma + beta


def _ref_layer(x, kv, p, heads, dim_head):
    inner = heads * dim_head
    scale = dim_head ** (-0.5)
    xn = _ln_ref(x, p["g1"], p["b1"])
    kvn = _ln_ref(kv, p["g1"], p["b1"])
    B, Nq, D = x.shape
    Nk = kv.shape[1]
    q = (xn @ p["wq"]).reshape(B, Nq, heads, dim_head).transpose(0, 2, 1, 3)
    kvp = kvn @ p["wkv"]
    k = kvp[..., :inner].reshape(B, Nk, heads, dim_head).transpose(0, 2, 1, 3)
    v = kvp[..., inner:].reshape(B, Nk, heads, dim_head).transpose(0, 2, 1, 3)
    dots = jnp.einsum("bhqd,bhkd->bhqk", q, k) * scale
    attn = jax.nn.softmax(dots, axis=-1)
    out = jnp.einsum("bhqk,bhkd->bhqd", attn, v)
    out = out.transpose(0, 2, 1, 3).reshape(B, Nq, inner)
    x1 = out + x
    xn2 = _ln_ref(x1, p["g2"], p["b2"])
    h = jax.nn.gelu(xn2 @ p["w1"] + p["bb1"], approximate=False)
    return h @ p["w2"] + p["bb2"] + x1


def _ref_forward(x, kv, params, heads, dim_head):
    for p in params:
        x = _ref_layer(x, kv, p, heads, dim_head)
    return x


def init_params(key, dim, depth, heads, dim_head, mlp_dim):
    inner = heads * dim_head
    params = []
    for l in range(depth):
        ks = jax.random.split(jax.random.fold_in(key, l), 8)
        p = dict(
            g1=1.0 + 0.05 * jax.random.normal(ks[0], (1, dim), jnp.float32),
            b1=0.05 * jax.random.normal(ks[1], (1, dim), jnp.float32),
            wq=0.05 * jax.random.normal(ks[2], (dim, inner), jnp.float32),
            wkv=0.05 * jax.random.normal(ks[3], (dim, 2 * inner), jnp.float32),
            g2=1.0 + 0.05 * jax.random.normal(ks[4], (1, dim), jnp.float32),
            b2=0.05 * jax.random.normal(ks[5], (1, dim), jnp.float32),
            w1=0.05 * jax.random.normal(ks[6], (dim, mlp_dim), jnp.float32),
            bb1=0.02 * jnp.arange(mlp_dim, dtype=jnp.float32).reshape(1, mlp_dim) / mlp_dim,
            w2=0.05 * jax.random.normal(ks[7], (mlp_dim, dim), jnp.float32),
            bb2=0.02 * jnp.arange(dim, dtype=jnp.float32).reshape(1, dim) / dim,
        )
        params.append(p)
    return params


if __name__ == "__main__":
    key = jax.random.PRNGKey(0)

    # Case 1: lane-aligned dim_head (direct head layout, residual dim == inner).
    B, Nq, Nk = 2, 8, 16
    dim, depth, heads, dim_head, mlp_dim = 256, 2, 2, 128, 512
    kx, kkv, kp = jax.random.split(jax.random.fold_in(key, 1), 3)
    x = jax.random.normal(kx, (B, Nq, dim), jnp.float32)
    key_value = jax.random.normal(kkv, (B, Nk, dim), jnp.float32)
    params = init_params(kp, dim, depth, heads, dim_head, mlp_dim)
    out = jax.block_until_ready(
        transformer_forward(x, key_value, params, heads, dim_head))
    ref = _ref_forward(x, key_value, params, heads, dim_head)
    assert out.shape == (B, Nq, dim)
    err1 = float(jnp.max(jnp.abs(out - ref)))
    # bf16 matmuls/output + approx reciprocal loosen the tolerance vs f32 ref.
    assert jnp.allclose(out, ref, atol=5e-2, rtol=5e-2), err1

    # Case 2: dim_head not a multiple of 128 -> bf16 scatter-repack path.
    B2, Nq2, Nk2 = 2, 8, 8
    dim2, depth2, heads2, dim_head2, mlp2 = 256, 1, 4, 64, 256
    kx2, kkv2, kp2 = jax.random.split(jax.random.fold_in(key, 2), 3)
    x2 = jax.random.normal(kx2, (B2, Nq2, dim2), jnp.float32)
    kv2 = jax.random.normal(kkv2, (B2, Nk2, dim2), jnp.float32)
    params2 = init_params(kp2, dim2, depth2, heads2, dim_head2, mlp2)
    out2 = jax.block_until_ready(
        transformer_forward(x2, kv2, params2, heads2, dim_head2))
    ref2 = _ref_forward(x2, kv2, params2, heads2, dim_head2)
    err2 = float(jnp.max(jnp.abs(out2 - ref2)))
    assert jnp.allclose(out2, ref2, atol=5e-2, rtol=5e-2), err2

    print("KERNEL_OK")
</pallas_src>

<mosaic_0001>
module attributes {stable_mosaic.version = 11 : i64} {
  func.func @_kv_proj_kernel(%arg0: i32, %arg1: i32, %arg2: memref<1x16x256xf32, #tpu.memory_space<vmem>>, %arg3: memref<1x1x256xf32, #tpu.memory_space<vmem>>, %arg4: memref<1x1x256xf32, #tpu.memory_space<vmem>>, %arg5: memref<1x256x256xbf16, #tpu.memory_space<vmem>>, %arg6: memref<1x256x256xbf16, #tpu.memory_space<vmem>>, %arg7: memref<1x1x16x256xbf16, #tpu.memory_space<vmem>>, %arg8: memref<1x1x16x256xbf16, #tpu.memory_space<vmem>>) attributes {dimension_semantics = [#tpu.dimension_semantics<parallel>, #tpu.dimension_semantics<parallel>], iteration_bounds = array<i64: 2, 2>, scalar_prefetch = 0 : i64, scratch_operands = 0 : i64, tpu.core_type = #tpu.core_type<tc>, window_params = [{transform_indices = @transform_0, window_bounds = array<i64: 1, 16, 256>}, {transform_indices = @transform_1, window_bounds = array<i64: 1, 1, 256>}, {transform_indices = @transform_2, window_bounds = array<i64: 1, 1, 256>}, {transform_indices = @transform_3, window_bounds = array<i64: 1, 256, 256>}, {transform_indices = @transform_4, window_bounds = array<i64: 1, 256, 256>}, {transform_indices = @transform_5, window_bounds = array<i64: 1, 1, 16, 256>}, {transform_indices = @transform_6, window_bounds = array<i64: 1, 1, 16, 256>}]} {
    %c0 = arith.constant 0 : index
    %c0_0 = arith.constant 0 : index
    %c0_1 = arith.constant 0 : index
    %0 = vector.load %arg2[%c0, %c0_0, %c0_1] : memref<1x16x256xf32, #tpu.memory_space<vmem>>, vector<1x16x256xf32>
    %1 = vector.shape_cast %0 : vector<1x16x256xf32> to vector<16x256xf32>
    %c0_2 = arith.constant 0 : index
    %c0_3 = arith.constant 0 : index
    %c0_4 = arith.constant 0 : index
    %2 = vector.load %arg3[%c0_2, %c0_3, %c0_4] : memref<1x1x256xf32, #tpu.memory_space<vmem>>, vector<1x1x256xf32>
    %3 = vector.shape_cast %2 : vector<1x1x256xf32> to vector<1x256xf32>
    %c0_5 = arith.constant 0 : index
    %c0_6 = arith.constant 0 : index
    %c0_7 = arith.constant 0 : index
    %4 = vector.load %arg4[%c0_5, %c0_6, %c0_7] : memref<1x1x256xf32, #tpu.memory_space<vmem>>, vector<1x1x256xf32>
    %5 = vector.shape_cast %4 : vector<1x1x256xf32> to vector<1x256xf32>
    %cst = arith.constant dense<0.000000e+00> : vector<16xf32>
    %6 = vector.multi_reduction <add>, %1, %cst [1] : vector<16x256xf32> to vector<16xf32>
    %7 = vector.shape_cast %6 : vector<16xf32> to vector<16x1xf32>
    %cst_8 = arith.constant 3.906250e-03 : f32
    %8 = vector.broadcast %cst_8 : f32 to vector<16x1xf32>
    %9 = arith.mulf %7, %8 : vector<16x1xf32>
    %10 = vector.broadcast %9 : vector<16x1xf32> to vector<16x256xf32>
    %11 = arith.subf %1, %10 : vector<16x256xf32>
    %12 = arith.mulf %11, %11 : vector<16x256xf32>
    %cst_9 = arith.constant dense<0.000000e+00> : vector<16xf32>
    %13 = vector.multi_reduction <add>, %12, %cst_9 [1] : vector<16x256xf32> to vector<16xf32>
    %14 = vector.shape_cast %13 : vector<16xf32> to vector<16x1xf32>
    %cst_10 = arith.constant 3.906250e-03 : f32
    %15 = vector.broadcast %cst_10 : f32 to vector<16x1xf32>
    %16 = arith.mulf %14, %15 : vector<16x1xf32>
    %cst_11 = arith.constant 9.99999974E-6 : f32
    %17 = vector.broadcast %cst_11 : f32 to vector<16x1xf32>
    %18 = arith.addf %16, %17 : vector<16x1xf32>
    %19 = math.rsqrt %18 : vector<16x1xf32>
    %20 = vector.broadcast %19 : vector<16x1xf32> to vector<16x256xf32>
    %21 = arith.mulf %11, %20 : vector<16x256xf32>
    %22 = vector.broadcast %3 : vector<1x256xf32> to vector<16x256xf32>
    %23 = arith.mulf %21, %22 : vector<16x256xf32>
    %24 = vector.broadcast %5 : vector<1x256xf32> to vector<16x256xf32>
    %25 = arith.addf %23, %24 : vector<16x256xf32>
    %26 = arith.truncf %25 : vector<16x256xf32> to vector<16x256xbf16>
    %c0_12 = arith.constant 0 : index
    %c0_13 = arith.constant 0 : index
    %c0_14 = arith.constant 0 : index
    %27 = vector.load %arg5[%c0_12, %c0_13, %c0_14] : memref<1x256x256xbf16, #tpu.memory_space<vmem>>, vector<1x256x256xbf16>
    %28 = vector.shape_cast %27 : vector<1x256x256xbf16> to vector<256x256xbf16>
    %cst_15 = arith.constant dense<0.000000e+00> : vector<16x256xf32>
    %29 = tpu.matmul %26, %28, %cst_15 {dimension_numbers = #tpu.dot_dimension_numbers<[1], [0], [0], [1], [0, 0, 1, 1], [], []>} : vector<16x256xbf16>, vector<256x256xbf16>, vector<16x256xf32> -> vector<16x256xf32>
    %30 = arith.truncf %29 : vector<16x256xf32> to vector<16x256xbf16>
    %c0_16 = arith.constant 0 : index
    %c0_17 = arith.constant 0 : index
    %c0_18 = arith.constant 0 : index
    %c0_19 = arith.constant 0 : index
    %31 = vector.load %arg7[%c0_16, %c0_17, %c0_18, %c0_19] : memref<1x1x16x256xbf16, #tpu.memory_space<vmem>>, vector<1x1x16x256xbf16>
    %32 = vector.shape_cast %31 : vector<1x1x16x256xbf16> to vector<16x256xbf16>
    %33 = vector.shape_cast %30 : vector<16x256xbf16> to vector<1x1x16x256xbf16>
    tpu.vector_store %arg7[%c0_16, %c0_17, %c0_18, %c0_19], %33 {strides = array<i32>} : memref<1x1x16x256xbf16, #tpu.memory_space<vmem>>, vector<1x1x16x256xbf16>,
    %c0_20 = arith.constant 0 : index
    %c0_21 = arith.constant 0 : index
    %c0_22 = arith.constant 0 : index
    %34 = vector.load %arg6[%c0_20, %c0_21, %c0_22] : memref<1x256x256xbf16, #tpu.memory_space<vmem>>, vector<1x256x256xbf16>
    %35 = vector.shape_cast %34 : vector<1x256x256xbf16> to vector<256x256xbf16>
    %cst_23 = arith.constant dense<0.000000e+00> : vector<16x256xf32>
    %36 = tpu.matmul %26, %35, %cst_23 {dimension_numbers = #tpu.dot_dimension_numbers<[1], [0], [0], [1], [0, 0, 1, 1], [], []>} : vector<16x256xbf16>, vector<256x256xbf16>, vector<16x256xf32> -> vector<16x256xf32>
    %37 = arith.truncf %36 : vector<16x256xf32> to vector<16x256xbf16>
    %c0_24 = arith.constant 0 : index
    %c0_25 = arith.constant 0 : index
    %c0_26 = arith.constant 0 : index
    %c0_27 = arith.constant 0 : index
    %38 = vector.load %arg8[%c0_24, %c0_25, %c0_26, %c0_27] : memref<1x1x16x256xbf16, #tpu.memory_space<vmem>>, vector<1x1x16x256xbf16>
    %39 = vector.shape_cast %38 : vector<1x1x16x256xbf16> to vector<16x256xbf16>
    %40 = vector.shape_cast %37 : vector<16x256xbf16> to vector<1x1x16x256xbf16>
    tpu.vector_store %arg8[%c0_24, %c0_25, %c0_26, %c0_27], %40 {strides = array<i32>} : memref<1x1x16x256xbf16, #tpu.memory_space<vmem>>, vector<1x1x16x256xbf16>,
    return
  }
  func.func @transform_0(%arg0: i32, %arg1: i32) -> (i32, i32, i32) {
    %c0_i32 = arith.constant 0 : i32
    %c0_i32_0 = arith.constant 0 : i32
    %c0_i32_1 = arith.constant 0 : i32
    return %arg1, %c0_i32, %c0_i32_0 : i32, i32, i32
  }
  func.func @transform_1(%arg0: i32, %arg1: i32) -> (i32, i32, i32) {
    %c0_i32 = arith.constant 0 : i32
    %c0_i32_0 = arith.constant 0 : i32
    %c0_i32_1 = arith.constant 0 : i32
    return %arg0, %c0_i32, %c0_i32_0 : i32, i32, i32
  }
  func.func @transform_2(%arg0: i32, %arg1: i32) -> (i32, i32, i32) {
    %c0_i32 = arith.constant 0 : i32
    %c0_i32_0 = arith.constant 0 : i32
    %c0_i32_1 = arith.constant 0 : i32
    return %arg0, %c0_i32, %c0_i32_0 : i32, i32, i32
  }
  func.func @transform_3(%arg0: i32, %arg1: i32) -> (i32, i32, i32) {
    %c0_i32 = arith.constant 0 : i32
    %c0_i32_0 = arith.constant 0 : i32
    %c0_i32_1 = arith.constant 0 : i32
    return %arg0, %c0_i32, %c0_i32_0 : i32, i32, i32
  }
  func.func @transform_4(%arg0: i32, %arg1: i32) -> (i32, i32, i32) {
    %c0_i32 = arith.constant 0 : i32
    %c0_i32_0 = arith.constant 0 : i32
    %c0_i32_1 = arith.constant 0 : i32
    return %arg0, %c0_i32, %c0_i32_0 : i32, i32, i32
  }
  func.func @transform_5(%arg0: i32, %arg1: i32) -> (i32, i32, i32, i32) {
    %c0_i32 = arith.constant 0 : i32
    %c0_i32_0 = arith.constant 0 : i32
    %c0_i32_1 = arith.constant 0 : i32
    return %arg0, %arg1, %c0_i32, %c0_i32_0 : i32, i32, i32, i32
  }
  func.func @transform_6(%arg0: i32, %arg1: i32) -> (i32, i32, i32, i32) {
    %c0_i32 = arith.constant 0 : i32
    %c0_i32_0 = arith.constant 0 : i32
    %c0_i32_1 = arith.constant 0 : i32
    return %arg0, %arg1, %c0_i32, %c0_i32_0 : i32, i32, i32, i32
  }
}

</mosaic_0001>

<bundles_post_ra>
// kernel: tpu_custom_call.1
= control target key start
LH: loop header
LB: loop body
LE: loop exit
PB: predicated region body
PF: predicated region fallthrough
CT: control target
= control target key end

     0   :  { %s2507_s0 = inlined_call_operand.hbm [shape: f32[2,16,256], index: 0, kind: input, shape index: {}]   ;;  %s2508_s1 = inlined_call_operand.hbm [shape: f32[2,1,256], index: 1, kind: input, shape index: {}]   ;;  %s2509_s2 = inlined_call_operand.hbm [shape: f32[2,1,256], index: 2, kind: input, shape index: {}]   ;;  %s2510_s3 = inlined_call_operand.hbm [shape: bf16[2,256,256], index: 3, kind: input, shape index: {}]   ;;  %s2511_s4 = inlined_call_operand.hbm [shape: bf16[2,256,256], index: 4, kind: input, shape index: {}]   ;;  %s2512_s5 = inlined_call_operand.hbm [shape: bf16[2,2,16,256], index: 5, kind: output, shape index: {0}]   ;;  %s2513_s6 = inlined_call_operand.hbm [shape: bf16[2,2,16,256], index: 6, kind: output, shape index: {1}]  }
   0x1   :  { %2534 = sst [smem:[#allocation33_spill]] %s2508_s1 }
   0x2   :  { %2535 = sst [smem:[#allocation34_spill]] %s2509_s2 }
   0x3   :  { %2536 = sst [smem:[#allocation35_spill]] %s2510_s3 }
   0x4   :  { %2537 = sst [smem:[#allocation36_spill]] %s2511_s4 }
   0x5   :  { %2538 = sst [smem:[#allocation37_spill]] %s2512_s5 }
   0x6   :  { %2539 = sst [smem:[#allocation38_spill]] %s2513_s6 }
   0x7   :  { %12 = vsyncpa [#allocation3], 0 }
   0x8   :  { %14 = vsyncpa [#allocation3 + $0x1], 0 }
   0x9   :  { %15 = vsyncpa [#allocation6], 0 }
   0xa   :  { %17 = vsyncpa [#allocation6 + $0x1], 0 }
   0xb   :  { %18 = vsyncpa [#allocation9], 0 }
   0xc   :  { %20 = vsyncpa [#allocation9 + $0x1], 0 }
   0xd   :  { %21 = vsyncpa [#allocation4], 0 }
   0xe   :  { %23 = vsyncpa [#allocation4 + $0x1], 0 }
   0xf   :  { %24 = vsyncpa [#allocation13], 0 }
  0x10   :  { %26 = vsyncpa [#allocation13 + $0x1], 0  ;;  %s2005_s21 = smov 0   ;;  %s2007_s22 = smov 0  }
  0x11   :  { %s2009_s23 = smov 0   ;;  %s2011_s24 = smov 0  }
  0x12   :  { %s2013_s25 = smov 0   ;;  %s2015_s26 = smov 0  }
  0x13   :  { %s2017_s27 = smov 0   ;;  %s2019_s28 = smov 0  }
  0x14   :  { %s2021_s29 = smov 0   ;;  %s2023_s30 = smov 0  }
  0x15   :  { %s2025_s7 = smov 0   ;;  %s2027_s8 = smov 0  }
  0x16   :  { %s2029_s9 = smov 0   ;;  %s2031_s10 = smov 0  }
  0x17 LB: > { %2540 = sst [smem:[#allocation19_spill]] %s1919_s25  ;;  %s2074_s11 = sadd.s32 4294967295, %s1955_s10   ;;  %s1955_s10 = sphi %s2031_s10, %s32_s10   ;;  %s1951_s9 = sphi %s2029_s9, %s2606_s9   ;;  %s1947_s8 = sphi %s2027_s8, %s2605_s8   ;;  %s1943_s7 = sphi %s2025_s7, %s2593_s7   ;;  %s1939_s30 = sphi %s2023_s30, %s2604_s30   ;;  %s1935_s29 = sphi %s2021_s29, %s2603_s29   ;;  %s1931_s28 = sphi %s2019_s28, %s2602_s28   ;;  %s1927_s27 = sphi %s2017_s27, %s2601_s27   ;;  %s1923_s26 = sphi %s2015_s26, %s2600_s26   ;;  %s1919_s25 = sphi %s2013_s25, %s2599_s25   ;;  %s1915_s24 = sphi %s2011_s24, %s2590_s24   ;;  %s1911_s23 = sphi %s2009_s23, %s2598_s23   ;;  %s1907_s22 = sphi %s2007_s22, %s2597_s22   ;;  %s1903_s21 = sphi %s2005_s21, %s2596_s21  }
  0x18   : > { %2541 = sst [smem:[#allocation20_spill]] %s1931_s28  ;;  %p59_p0 = scmp.eq.s32.totalorder %s1955_s10, 0 }
  0x19   : > { %2542 = sst [smem:[#allocation21_spill]] %s1939_s30  ;;  %p65_p1 = scmp.eq.s32.totalorder %s2074_s11, 0 }
  0x1a   : > { %2543 = sst [smem:[#allocation22_spill]] %s1943_s7  ;;  %p84_p2 = scmp.ne.s32.totalorder %s1923_s26, %s1919_s25 }
  0x1b   : > { %2544 = sst [smem:[#allocation23_spill]] %s1951_s9  ;;  %p90_p3 = scmp.ne.s32.totalorder %s1919_s25, %s1915_s24 }
  0x1c   : > { %2545 = sst [smem:[#allocation24_spill]] %s2074_s11  ;;  %p194_p4 = scmp.eq.s32.totalorder %s2074_s11, 3 }
  0x1d   : > { %p86_p5 = por %p84_p2, %p59_p0  ;;  %p2088_p6 = por %p90_p3, %p65_p1 }
  0x1e   : > { %p2519_p7 = scmp.lt.s32.totalorder %s1955_s10, 4  ;;  %s271_s16 = sand.u32 1, %s1923_s26  }
  0x1f   : > { %s2546_s14 = scalar_select %p2088_p6, 1, 0 }
  0x20   : > { %s2095_s17 = sshll.u32 %s271_s16, 1  ;;  %s1368_s18 = sshll.u32 %s1951_s9, 5 }
  0x21   : > { %2547 = sst [smem:[#allocation25_spill]] %s2546_s14  ;;  %s273_s24 = scalar_lea.vmem [#allocation5], %s2095_s17 }
  0x22   : > { %s2548_s1 = sld [smem:[#allocation33_spill]]  ;;  %s281_s12 = sshll.u32 %s273_s24, 4  ;;  %s282_s12 = int_to_ptr.vmem [resolvable:$true] %s281_s12 }
  0x23   : > { %p2104_p8 = pnand %p2519_p7, %p86_p5  ;;  %s2550_s2 = sld [smem:[#allocation34_spill]] }
  0x24   : > { %s2551_s30 = sand.u32 1, %s1955_s10   ;;  %s1646_s19 = scalar_lea.vmem %s282_s12, 32 }
  0x25   : > { %s2115_s14 = scalar_lea.sflag [#allocation6], %s2551_s30  ;;  %p2521_p9 = pneg %p2104_p8 }
  0x26   : > { %p1647_p10 = scmp.ne.s32.totalorder %s282_s12, %s1646_s19  ;;  %s1957_s20 = smov [#allocation5]  }
  0x27   : > { %s1651_s24 = sshll.u32 %s1957_s20, 4  ;;  %s1652_s24 = int_to_ptr.vmem [resolvable:$false] %s1651_s24 }
  0x28   : > { %s279_s13 = scalar_lea.hbm %s2548_s1, %s1368_s18  ;;  %p1649_p11 = pnand %p1647_p10, %p2521_p9 }
  0x29   : > { %s2111_s15 = scalar_lea.hbm %s2550_s2, %s1368_s18  ;;  %s1653_s1 = scalar_lea.vmem %s1652_s24, 64 }
  0x2a   : > { %p1650_p12 = pneg %p1649_p11  ;;  %p1654_p13 = scmp.lt.s32.totalorder %s282_s12, %s1652_s24 }
  0x2b   : > { %p1655_p2 = scmp.lt.s32.totalorder %s1653_s1, %s1646_s19 }
  0x2d   : > { %p1656_p3 = por %p1655_p2, %p1654_p13 }
  0x2f   : > { %p1657_p5 = pnand %p1656_p3, %p1650_p12 }
  0x31   : > { %1660 = shalt.err (!%p1657_p5)
}
  0x32   : > { %1396 = dma.hbm_to_vmem [thread:$0]  (!%p2104_p8), %s279_s13, 32, %s282_s12, %s2115_s14  }
  0x33   : > { %s1275_s5 = sshll.u32 %s271_s16, 8  ;;  %p1281_p10 = scmp.ge.s32.totalorder %s1955_s10, 1 }
  0x34   : > { %s311_s30 = scalar_lea.vmem [#allocation8], %s1275_s5  ;;  %s332_s18 = scalar_lea.vmem [#allocation10], %s1275_s5 }
  0x35   : > { %s318_s7 = sshll.u32 %s311_s30, 4  ;;  %s339_s20 = sshll.u32 %s332_s18, 4  ;;  %s2126_s20 = int_to_ptr.vmem [resolvable:$true] %s339_s20  ;;  %s319_s7 = int_to_ptr.vmem [resolvable:$true] %s318_s7 }
  0x36   : > { %p347_p11 = scmp.lt.s32.totalorder %s1955_s10, 5  ;;  %s1370_s1 = sshll.u32 %s1951_s9, 12 }
  0x37   : > { %s2554_s3 = sld [smem:[#allocation35_spill]]  ;;  %s2555_s13 = sand.u32 1, %s1955_s10  }
  0x38   : > { %p2130_p12 = pnand %p1281_p10, %p347_p11  ;;  %s2139_s16 = scalar_lea.sflag [#allocation9], %s2555_s13 }
  0x39   : > { %s1674_s25 = scalar_lea.vmem %s319_s7, 4096  ;;  %s1958_s5 = smov [#allocation8]  }
  0x3a   : > { %s2552_s19 = scalar_select %p2130_p12, 1, 0 }
  0x3b   : > { %p1675_p13 = scmp.ne.s32.totalorder %s319_s7, %s1674_s25  ;;  %s1679_s30 = sshll.u32 %s1958_s5, 4  ;;  %s1680_s30 = int_to_ptr.vmem [resolvable:$false] %s1679_s30 }
  0x3c   : > { %2553 = sst [smem:[#allocation26_spill]] %s2552_s19  ;;  %s1681_s18 = scalar_lea.vmem %s1680_s30, 8192 }
  0x3d   : > { %s317_s12 = scalar_lea.hbm %s2554_s3, %s1370_s1  ;;  %p1677_p2 = pnand %p1675_p13, %p2521_p9 }
  0x3e   : > { %p1682_p5 = scmp.lt.s32.totalorder %s319_s7, %s1680_s30  ;;  %p1683_p10 = scmp.lt.s32.totalorder %s1681_s18, %s1674_s25 }
  0x3f   : > { %p1678_p3 = pneg %p1677_p2 }
  0x40   : > { %p1684_p11 = por %p1683_p10, %p1682_p5 }
  0x42   : > { %p1685_p7 = pnand %p1684_p11, %p1678_p3 }
  0x44   : > { %1688 = shalt.err (!%p1685_p7)
}
  0x45   : > { %s2522_s2 = smov 128   ;;  %s2523_s24 = smov 8  }
  0x46   : > { %1402 = dma.hbm_to_vmem [thread:$0]  (!%p2104_p8), %s317_s12, 4096, %s319_s7, %s2139_s16, %s2522_s2, %s2522_s2, %s2523_s24  }
  0x47   : > { %s2556_s4 = sld [smem:[#allocation36_spill]]  ;;  %s1263_s30 = sadd.s32 4294967294, %s1955_s10  }
  0x48   : > { %s41_s18 = sadd.s32 1, %s1947_s8  ;;  %s51_s3 = sadd.s32 1, %s1935_s29 }
  0x49   : > { %p42_p7 = scmp.ge.s32.totalorder %s41_s18, 2  ;;  %p58_p13 = scmp.ne.s32.totalorder %s1935_s29, %s1931_s28 }
  0x4a   : > { %p64_p2 = scmp.ne.s32.totalorder %s1931_s28, %s1927_s27  ;;  %s183_s19 = sadd.s32 1, %s1911_s23 }
  0x4b   : > { %s2608_s18 = smov (%p42_p7, %s41_s18), 0  ;;  %s2559_s7 = sadd.s32 1, %s1951_s9 }
  0x4c   : > { %2558 = sst [smem:[#allocation28_spill]] %s2608_s18  ;;  %s2610_s7 = smov (!%p42_p7, %s2559_s7), %s1951_s9 }
  0x4d   : > { %s2153_s5 = scalar_lea.hbm %s2556_s4, %s1370_s1  ;;  %s48_s1 = ssub.s32 %s1947_s8, %s2608_s18 }
  0x4e   : > { %2557 = sst [smem:[#allocation27_spill]] %s2153_s5  ;;  %p2172_p3 = por %p59_p0, %p58_p13 }
  0x4f   : > { %p46_p5 = scmp.ge.s32.totalorder %s2610_s7, 2  ;;  %p49_p10 = scmp.eq.s32.totalorder %s48_s1, 0 }
  0x50   : > { %p2178_p11 = por %p65_p1, %p64_p2  ;;  %p193_p9 = scmp.ne.s32.totalorder %s1911_s23, %s1907_s22 }
  0x51   : > { %s2612_s7 = smov (%p46_p5, %s2610_s7), 0  ;;  %p199_p13 = scmp.ne.s32.totalorder %s1907_s22, %s1903_s21 }
  0x52   : > { %s2561_s27 = scalar_select %p2178_p11, 1, 0 }
  0x53   : > { %2563 = sst [smem:[#allocation30_spill]] %s2612_s7  ;;  %s74_s13 = ssub.s32 %s1951_s9, %s2612_s7 }
  0x54   : > { %2562 = sst [smem:[#allocation29_spill]] %s2561_s27  ;;  %p2193_p0 = por %p194_p4, %p193_p9 }
  0x55   : > { %s2187_s25 = scalar_select %p49_p10, %s1935_s29, %s51_s3  }
  0x56   : > { %s2565_s2 = scalar_select %p2193_p0, 1, 0 }
  0x57   : > { %2564 = sst [smem:[#allocation31_spill]] %s2187_s25  ;;  %p75_p7 = scmp.eq.s32.totalorder %s74_s13, 0 }
  0x58   : > { %2566 = sst [smem:[#allocation32_spill]] %s2565_s2  ;;  %s180_s24 = sor.u32 %s74_s13, %s48_s1 }
  0x59   : > { %p181_p1 = scmp.eq.s32.totalorder %s180_s24, 0  ;;  %s2567_s4 = sadd.s32 1, %s1923_s26 }
  0x5a   : > { %s2202_s18 = scalar_select %p75_p7, %s1923_s26, %s2567_s4  }
  0x5b   : > { %s2205_s27 = scalar_select %p181_p1, %s1911_s23, %s183_s19  }
  0x5c   : > { %p200_p2 = scmp.eq.s32.totalorder %s1263_s30, 3  ;;  %s248_s3 = sand.u32 1, %s1935_s29  }
  0x5d   : > { %s1266_s7 = sshll.u32 %s248_s3, 5  ;;  %s1367_s25 = sshll.u32 %s1947_s8, 9 }
  0x5e   : > { %p2208_p5 = por %p200_p2, %p199_p13  ;;  %s252_s2 = scalar_lea.vmem [#allocation2], %s1266_s7 }
  0x5f   : > { %s259_s11 = sshll.u32 %s252_s2, 4  ;;  %s258_s24 = scalar_lea.hbm %s2507_s0, %s1367_s25  ;;  %s260_s11 = int_to_ptr.vmem [resolvable:$true] %s259_s11 }
  0x60   : > { %s2568_s9 = scalar_select %p2208_p5, 1, 0 }
  0x61   : > { %p2569_p4 = scmp.lt.s32.totalorder %s1955_s10, 4  ;;  %s292_s19 = scalar_lea.vmem [#allocation7], %s2095_s17 }
  0x62   : > { %s300_s30 = sshll.u32 %s292_s19, 4  ;;  %s249_s1 = scalar_lea.sflag [#allocation3], %s248_s3  ;;  %s2225_s30 = int_to_ptr.vmem [resolvable:$true] %s300_s30 }
  0x63   : > { %p2220_p9 = pnand %p2569_p4, %p2172_p3  ;;  %s1702_s2 = scalar_lea.vmem %s260_s11, 512 }
  0x64   : > { %p1703_p7 = scmp.ne.s32.totalorder %s260_s11, %s1702_s2  ;;  %s1961_s28 = smov [#allocation2]  }
  0x65   : > { %p1691_p10 = pneg %p2220_p9  ;;  %s1707_s5 = sshll.u32 %s1961_s28, 4  ;;  %s1708_s5 = int_to_ptr.vmem [resolvable:$false] %s1707_s5 }
  0x66   : > { %s1709_s7 = scalar_lea.vmem %s1708_s5, 1024  ;;  %p1710_p3 = scmp.lt.s32.totalorder %s260_s11, %s1708_s5 }
  0x67   : > { %p1705_p1 = pnand %p1703_p7, %p1691_p10  ;;  %p1711_p2 = scmp.lt.s32.totalorder %s1709_s7, %s1702_s2 }
  0x69   : > { %p1706_p13 = pneg %p1705_p1  ;;  %p1712_p4 = por %p1711_p2, %p1710_p3 }
  0x6b   : > { %p1713_p5 = pnand %p1712_p4, %p1706_p13 }
  0x6d   : > { %1716 = shalt.err (!%p1713_p5)
}
  0x6e   : > { %s1962_s17 = smov 256   ;;  %s1963_s12 = smov 16  }
  0x6f   : > { %1393 = dma.hbm_to_vmem [thread:$0]  (!%p2220_p9), %s258_s24, 512, %s260_s11, %s249_s1, %s1962_s17, %s1962_s17, %s1963_s12  }
  0x70   : > { %s1730_s25 = scalar_lea.vmem %s2225_s30, 32  ;;  %p2571_p7 = pneg %p2104_p8 }
  0x71   : > { %p1731_p10 = scmp.ne.s32.totalorder %s2225_s30, %s1730_s25  ;;  %s1964_s13 = smov [#allocation7]  }
  0x72   : > { %s1735_s3 = sshll.u32 %s1964_s13, 4  ;;  %s1736_s3 = int_to_ptr.vmem [resolvable:$false] %s1735_s3 }
  0x73   : > { %p1733_p1 = pnand %p1731_p10, %p2571_p7  ;;  %s1737_s19 = scalar_lea.vmem %s1736_s3, 64 }
  0x74   : > { %p1738_p5 = scmp.lt.s32.totalorder %s2225_s30, %s1736_s3  ;;  %p1739_p13 = scmp.lt.s32.totalorder %s1737_s19, %s1730_s25 }
  0x75   : > { %p1734_p0 = pneg %p1733_p1 }
  0x76   : > { %p1740_p3 = por %p1739_p13, %p1738_p5 }
  0x78   : > { %p1741_p2 = pnand %p1740_p3, %p1734_p0 }
  0x7a   : > { %1744 = shalt.err (!%p1741_p2)
}
  0x7b   : > { %1399 = dma.hbm_to_vmem [thread:$0]  (!%p2104_p8), %s2111_s15, 32, %s2225_s30, %s2115_s14  }
  0x7c   : > { %s1758_s11 = scalar_lea.vmem %s2126_s20, 4096  ;;  %p2572_p4 = pmov %p2571_p7 }
  0x7d   : > { %p1759_p9 = scmp.ne.s32.totalorder %s2126_s20, %s1758_s11  ;;  %s1965_s24 = smov [#allocation10]  }
  0x7e   : > { %s1763_s4 = sshll.u32 %s1965_s24, 4  ;;  %s1764_s4 = int_to_ptr.vmem [resolvable:$false] %s1763_s4 }
  0x7f   : > { %p1761_p10 = pnand %p1759_p9, %p2572_p4  ;;  %s1765_s1 = scalar_lea.vmem %s1764_s4, 8192 }
  0x80   : > { %p1766_p0 = scmp.lt.s32.totalorder %s2126_s20, %s1764_s4  ;;  %p1767_p1 = scmp.lt.s32.totalorder %s1765_s1, %s1758_s11 }
  0x81   : > { %p1762_p7 = pneg %p1761_p10 }
  0x82   : > { %p1768_p5 = por %p1767_p1, %p1766_p0 }
  0x84   : > { %p1769_p13 = pnand %p1768_p5, %p1762_p7 }
  0x86   : > { %1772 = shalt.err (!%p1769_p13)
}
  0x87   : > { %s2573_s2 = smov 8   ;;  %s2574_s28 = smov 128  }
  0x88   : > { %s2575_s14 = sld [smem:[#allocation27_spill]] }
  0x89   : > { %s2577_s30 = sld [smem:[#allocation20_spill]] (!%p2130_p12) }
  0x8a   : > { %351 = sbr.rel (%p2130_p12) target bundleno = 716 (0x2cc), region = 40 }
  0x8e   : > { %1405 = dma.hbm_to_vmem [thread:$0]  (!%p2104_p8), %s2575_s14, 4096, %s2126_s20, %s2139_s16, %s2574_s28, %s2574_s28, %s2573_s2  }
  0x8f   : > { %s353_s7 = sand.u32 1, %s2577_s30  }
  0x90   : > { %s1282_s17 = sshll.u32 %s353_s7, 5  ;;  %s354_s12 = scalar_lea.sflag [#allocation3], %s353_s7 }
  0x91   : > { %s357_s25 = scalar_lea.vmem [#allocation2], %s1282_s17 }
  0x92   : > { %1882 = dma.done.wait (%p2178_p11), %s354_s12, 512  }
  0x93   : > { %1884 = vsyncadd (%p2178_p11), %s354_s12, 4294966784  ;;  %s2579_s6 = sld [smem:[#allocation24_spill]] }
  0x94   : > { %s2580_s13 = sld [smem:[#allocation19_spill]] }
  0x99   : > { %s362_s19 = sand.u32 1, %s2579_s6  }
  0x9a   : > { %s364_s11 = sand.u32 1, %s2580_s13   ;;  %s363_s16 = scalar_lea.sflag [#allocation6], %s362_s19 }
  0x9b   : > { %s2265_s20 = sshll.u32 %s364_s11, 1 }
  0x9c   : > { %s366_s24 = scalar_lea.vmem [#allocation5], %s2265_s20 }
  0x9d   : > { %1886 = dma.done.wait (%p2088_p6), %s363_s16, 64  }
  0x9e   : > { %1888 = vsyncadd (%p2088_p6), %s363_s16, 4294967232  ;;  %s1285_s4 = sshll.u32 %s364_s11, 8  ;;  %s375_s1 = scalar_lea.vmem [#allocation7], %s2265_s20 }
  0x9f   : > { %s381_s2 = scalar_lea.sflag [#allocation9], %s362_s19  ;;  %s2273_s28 = scalar_lea.vmem [#allocation8], %s1285_s4 }
  0xa0   : > { %1890 = dma.done.wait (%p2088_p6), %s381_s2, 8192  }
  0xa1   : > { %1892 = vsyncadd (%p2088_p6), %s381_s2, 4294959104  ;;  %v2279_v0 = vld [vmem:[%s357_s25] sm:$0xff]  ;;  %v2281_v1 = vld [vmem:[%s357_s25 + $0x8] sm:$0xff]  ;;  %s2293_s14 = scalar_lea.vmem [#allocation10], %s1285_s4  ;;  %s2582_s15 = sld [smem:[#allocation21_spill]] }
  0xa2   : > { %v2283_v2 = vld [vmem:[%s357_s25 + $0x10] sm:$0xff]  ;;  %v453_v3 = vadd.f32 %v2281_v1, %v2279_v0  ;;  %v2287_v4 = vld [vmem:[%s357_s25 + $0x18] sm:$0xff]  ;;  %s2583_s30 = sld [smem:[#allocation22_spill]]  ;;  %s2386_s5 = sand.u32 1, %s1907_s22  }
  0xa3   : > { %v456_v5 = vadd.f32 %v2287_v4, %v2283_v2  ;;  %v1533_v6 = vld [vmem:[%s2273_s28 + $0x74] ss:$8 sps:$4 sm:$0xff]   ;;  %v1537_v7 = vld [vmem:[%s2273_s28 + $0x70] ss:$8 sps:$4 sm:$0xff]   ;;  %v1539_v10 = vld [vmem:[%s2273_s28 + $0x64] ss:$8 sps:$4 sm:$0xff]  }
  0xa4   : > { %454 = vadd.xlane.f32.xlu0 %v453_v3  ;;  %v1535_v8 = vld [vmem:[%s2293_s14 + $0x74] ss:$8 sps:$4 sm:$0xff]   ;;  %709 = vmatprep.subr.bf16.mxu0 %v1533_v6  ;;  %v1538_v9 = vld [vmem:[%s2293_s14 + $0x70] ss:$8 sps:$4 sm:$0xff]   ;;  %v1541_v11 = vld [vmem:[%s2293_s14 + $0x64] ss:$8 sps:$4 sm:$0xff]  }
  0xa5   : > { %958 = vmatprep.subr.bf16.mxu1 %v1535_v8  ;;  %710 = vmatpush1.bf16.msra.mxu0 %v1537_v7  ;;  %v1543_v12 = vld [vmem:[%s2273_s28 + $0x60] ss:$8 sps:$4 sm:$0xff]   ;;  %v1545_v14 = vld [vmem:[%s2273_s28 + $0x54] ss:$8 sps:$4 sm:$0xff]   ;;  %v1549_v16 = vld [vmem:[%s2273_s28 + $0x50] ss:$8 sps:$4 sm:$0xff]  }
  0xa6   : > { %959 = vmatpush1.bf16.msra.mxu1 %v1538_v9  ;;  %711 = vmatprep.subr.bf16.mxu0 %v1539_v10  ;;  %v1544_v13 = vld [vmem:[%s2293_s14 + $0x60] ss:$8 sps:$4 sm:$0xff]   ;;  %v1547_v15 = vld [vmem:[%s2293_s14 + $0x54] ss:$8 sps:$4 sm:$0xff]   ;;  %v1550_v17 = vld [vmem:[%s2293_s14 + $0x50] ss:$8 sps:$4 sm:$0xff]  }
  0xa7   : > { %960 = vmatprep.subr.bf16.mxu1 %v1541_v11  ;;  %v1551_v18 = vld [vmem:[%s2273_s28 + $0x44] ss:$8 sps:$4 sm:$0xff]   ;;  %v1555_v20 = vld [vmem:[%s2273_s28 + $0x40] ss:$8 sps:$4 sm:$0xff]   ;;  %v1557_v22 = vld [vmem:[%s2273_s28 + $0x34] ss:$8 sps:$4 sm:$0xff]  }
  0xa8   : > { %457 = vadd.xlane.f32.xlu0 %v456_v5  ;;  %v1553_v19 = vld [vmem:[%s2293_s14 + $0x44] ss:$8 sps:$4 sm:$0xff]   ;;  %v1556_v21 = vld [vmem:[%s2293_s14 + $0x40] ss:$8 sps:$4 sm:$0xff]   ;;  %v1559_v23 = vld [vmem:[%s2293_s14 + $0x34] ss:$8 sps:$4 sm:$0xff]  }
  0xa9   : > { %712 = vmatpush1.bf16.msra.mxu0 %v1543_v12  ;;  %v1561_v24 = vld [vmem:[%s2273_s28 + $0x30] ss:$8 sps:$4 sm:$0xff]   ;;  %v1563_v26 = vld [vmem:[%s2273_s28 + $0x24] ss:$8 sps:$4 sm:$0xff]   ;;  %v1567_v28 = vld [vmem:[%s2273_s28 + $0x20] ss:$8 sps:$4 sm:$0xff]  }
  0xaa   : > { %961 = vmatpush1.bf16.msra.mxu1 %v1544_v13  ;;  %713 = vmatprep.subr.bf16.mxu0 %v1545_v14  ;;  %v1562_v25 = vld [vmem:[%s2293_s14 + $0x30] ss:$8 sps:$4 sm:$0xff]   ;;  %v1565_v27 = vld [vmem:[%s2293_s14 + $0x24] ss:$8 sps:$4 sm:$0xff]   ;;  %v1568_v29 = vld [vmem:[%s2293_s14 + $0x20] ss:$8 sps:$4 sm:$0xff]  }
  0xab   : > { %962 = vmatprep.subr.bf16.mxu1 %v1547_v15  ;;  %v1569_v30 = vld [vmem:[%s2273_s28 + $0x14] ss:$8 sps:$4 sm:$0xff]   ;;  %v1573_v32 = vld [vmem:[%s2273_s28 + $0x10] ss:$8 sps:$4 sm:$0xff]   ;;  %v1575_v34 = vld [vmem:[%s2273_s28 + $0x4] ss:$8 sps:$4 sm:$0xff]  }
  0xac   : > { %v1571_v31 = vld [vmem:[%s2293_s14 + $0x14] ss:$8 sps:$4 sm:$0xff]   ;;  %v1574_v33 = vld [vmem:[%s2293_s14 + $0x10] ss:$8 sps:$4 sm:$0xff]   ;;  %v1577_v35 = vld [vmem:[%s2293_s14 + $0x4] ss:$8 sps:$4 sm:$0xff]  }
  0xad   : > { %714 = vmatpush1.bf16.msra.mxu0 %v1549_v16  ;;  %v1579_v36 = vld [vmem:[%s2273_s28] ss:$8 sps:$4 sm:$0xff]   ;;  %v1581_v38 = vld [vmem:[%s2273_s28 + $0xf4] ss:$8 sps:$4 sm:$0xff]   ;;  %v1585_v54 = vld [vmem:[%s2273_s28 + $0xf0] ss:$8 sps:$4 sm:$0xff]  }
  0xae   : > { %963 = vmatpush1.bf16.msra.mxu1 %v1550_v17  ;;  %715 = vmatprep.subr.bf16.mxu0 %v1551_v18  ;;  %v1580_v37 = vld [vmem:[%s2293_s14] ss:$8 sps:$4 sm:$0xff]   ;;  %v1583_v39 = vld [vmem:[%s2293_s14 + $0xf4] ss:$8 sps:$4 sm:$0xff]   ;;  %v1586_v55 = vld [vmem:[%s2293_s14 + $0xf0] ss:$8 sps:$4 sm:$0xff]  }
  0xaf   : > { %964 = vmatprep.subr.bf16.mxu1 %v1553_v19  ;;  %v1587_v56 = vld [vmem:[%s2273_s28 + $0xe4] ss:$8 sps:$4 sm:$0xff]   ;;  %v1591_v58 = vld [vmem:[%s2273_s28 + $0xe0] ss:$8 sps:$4 sm:$0xff]   ;;  %v1593_v60 = vld [vmem:[%s2273_s28 + $0xd4] ss:$8 sps:$4 sm:$0xff]  }
  0xb0   : > { %v1589_v57 = vld [vmem:[%s2293_s14 + $0xe4] ss:$8 sps:$4 sm:$0xff]   ;;  %v1592_v59 = vld [vmem:[%s2293_s14 + $0xe0] ss:$8 sps:$4 sm:$0xff]   ;;  %v1595_v61 = vld [vmem:[%s2293_s14 + $0xd4] ss:$8 sps:$4 sm:$0xff]  }
  0xb1   : > { %716 = vmatpush1.bf16.msra.mxu0 %v1555_v20  ;;  %v1597_v62 = vld [vmem:[%s2273_s28 + $0xd0] ss:$8 sps:$4 sm:$0xff]   ;;  %v1604_v3 = vld [vmem:[%s2293_s14 + $0xc0] ss:$8 sps:$4 sm:$0xff]   ;;  %v1607_v5 = vld [vmem:[%s2293_s14 + $0xb4] ss:$8 sps:$4 sm:$0xff]  }
  0xb2   : > { %965 = vmatpush1.bf16.msra.mxu1 %v1556_v21  ;;  %717 = vmatprep.subr.bf16.mxu0 %v1557_v22  ;;  %v1598_v63 = vld [vmem:[%s2293_s14 + $0xd0] ss:$8 sps:$4 sm:$0xff]   ;;  %v1611_v8 = vld [vmem:[%s2273_s28 + $0xa4] ss:$8 sps:$4 sm:$0xff]   ;;  %v1615_v10 = vld [vmem:[%s2273_s28 + $0xa0] ss:$8 sps:$4 sm:$0xff]  }
  0xb3   : > { %966 = vmatprep.subr.bf16.mxu1 %v1559_v23  ;;  %v1609_v6 = vld [vmem:[%s2273_s28 + $0xb0] ss:$8 sps:$4 sm:$0xff]   ;;  %v1613_v9 = vld [vmem:[%s2293_s14 + $0xa4] ss:$8 sps:$4 sm:$0xff]   ;;  %v1616_v11 = vld [vmem:[%s2293_s14 + $0xa0] ss:$8 sps:$4 sm:$0xff]  }
  0xb4   : > { %v1610_v7 = vld [vmem:[%s2293_s14 + $0xb0] ss:$8 sps:$4 sm:$0xff]   ;;  %v1617_v12 = vld [vmem:[%s2273_s28 + $0x94] ss:$8 sps:$4 sm:$0xff]   ;;  %v1623_v16 = vld [vmem:[%s2273_s28 + $0x84] ss:$8 sps:$4 sm:$0xff]  }
  0xb5   : > { %718 = vmatpush1.bf16.msra.mxu0 %v1561_v24  ;;  %v1619_v13 = vld [vmem:[%s2293_s14 + $0x94] ss:$8 sps:$4 sm:$0xff]   ;;  %v1621_v14 = vld [vmem:[%s2273_s28 + $0x90] ss:$8 sps:$4 sm:$0xff]   ;;  %v1625_v17 = vld [vmem:[%s2293_s14 + $0x84] ss:$8 sps:$4 sm:$0xff]  }
  0xb6   : > { %967 = vmatpush1.bf16.msra.mxu1 %v1562_v25  ;;  %719 = vmatprep.subr.bf16.mxu0 %v1563_v26  ;;  %v1622_v15 = vld [vmem:[%s2293_s14 + $0x90] ss:$8 sps:$4 sm:$0xff]   ;;  %v1627_v18 = vld [vmem:[%s2273_s28 + $0x80] ss:$8 sps:$4 sm:$0xff]   ;;  %v486_v26 = vlaneseq  ;;  %s1359_s7 = sshll.u32 %s2582_s15, 2  ;;  %s1360_s17 = sshll.u32 %s2583_s30, 3 }
  0xb7   : > { %968 = vmatprep.subr.bf16.mxu1 %v1565_v27  ;;  %v1628_v19 = vld [vmem:[%s2293_s14 + $0x80] ss:$8 sps:$4 sm:$0xff]   ;;  %s1287_s12 = sshll.u32 %s2386_s5, 4  ;;  %s1033_s25 = sadd.s32 %s1360_s17, %s1359_s7 }
  0xb8   : > { %v487_v27 = vshrl.u32 %v486_v26, 7  ;;  %s439_s6 = scalar_lea.vmem [#allocation11], %s1287_s12  ;;  %s1361_s3 = sshll.u32 %s1033_s25, 6 }
  0xb9   : > { %720 = vmatpush1.bf16.msra.mxu0 %v1567_v28  ;;  %s1036_s13 = sshll.u32 %s439_s6, 4  ;;  %s446_s19 = scalar_lea.vmem [#allocation12], %s1287_s12  ;;  %s2391_s13 = int_to_ptr.vmem [resolvable:$true] %s1036_s13 }
  0xba   : > { %969 = vmatpush1.bf16.msra.mxu1 %v1568_v29  ;;  %721 = vmatprep.subr.bf16.mxu0 %v1569_v30  ;;  %v488_v28 = vsub.s32 0, %v487_v27  ;;  %v492_v29 = vsub.s32 1, %v487_v27  ;;  %v451_v30 = vld [vmem:[%s366_s24] sm:$0x3]  ;;  %s2584_s11 = sld [smem:[#allocation32_spill]]  ;;  %s1054_s20 = sshll.u32 %s446_s19, 4  ;;  %s2398_s20 = int_to_ptr.vmem [resolvable:$true] %s1054_s20 }
  0xbb   : > { %970 = vmatprep.subr.bf16.mxu1 %v1571_v31  ;;  %s2585_s4 = sld [smem:[#allocation37_spill]]  ;;  %s1016_s30 = scalar_lea.sflag [#allocation4], %s2386_s5 }
  0xbc   : > { %s1773_s7 = scalar_lea.vmem %s2391_s13, 256  ;;  %s1966_s17 = smov [#allocation11]  }
  0xbd   : > { %722 = vmatpush1.bf16.msra.mxu0 %v1573_v32  ;;  %v452_v32 = vld [vmem:[%s375_s1] sm:$0x3]  ;;  %p1774_p6 = scmp.ne.s32.totalorder %s2391_s13, %s1773_s7  ;;  %s1777_s12 = sshll.u32 %s1966_s17, 4  ;;  %s1778_s12 = int_to_ptr.vmem [resolvable:$false] %s1777_s12 }
  0xbe   : > { %971 = vmatpush1.bf16.msra.mxu1 %v1574_v33  ;;  %723 = vmatprep.subr.bf16.mxu0 %v1575_v34  ;;  %v489_v34 = vrot.slane %v451_v30, %v488_v28  ;;  %s1779_s25 = scalar_lea.vmem %s1778_s12, 512  ;;  %p1780_p3 = scmp.lt.s32.totalorder %s2391_s13, %s1778_s12 }
  0xbf   : > { %972 = vmatprep.subr.bf16.mxu1 %v1577_v35  ;;  %v493_v35 = vrot.slane %v451_v30, %v492_v29  ;;  %p1781_p2 = scmp.lt.s32.totalorder %s1779_s25, %s1773_s7 }
  0xc0   : > { %p2587_p8 = scmp.ne.s32.totalorder %s2584_s11, 0 }
  0xc1   : > { %724 = vmatpush1.bf16.msra.mxu0 %v1579_v36  ;;  %s2396_s1 = scalar_lea.hbm %s2585_s4, %s1361_s3  ;;  %p1782_p9 = por %p1781_p2, %p1780_p3 }
  0xc2   : > { %973 = vmatpush1.bf16.msra.mxu1 %v1580_v37  ;;  %725 = vmatprep.subr.bf16.mxu0 %v1581_v38  ;;  %v504_v38 = vrot.slane %v452_v32, %v488_v28  ;;  %p1775_p12 = pnand %p1774_p6, %p2587_p8 }
  0xc3   : > { %974 = vmatprep.subr.bf16.mxu1 %v1583_v39  ;;  %v508_v39 = vrot.slane %v452_v32, %v492_v29 }
  0xc4   : > { %p1776_p11 = pneg %p1775_p12 }
  0xc5   : > { %726 = vmatpush2.bf16.msra.mxu0 %v1585_v54 }
  0xc6   : > { %975 = vmatpush2.bf16.msra.mxu1 %v1586_v55  ;;  %727 = vmatprep.subr.bf16.mxu0 %v1587_v56  ;;  %p1783_p4 = pnand %p1782_p9, %p1776_p11 }
  0xc7   : > { %976 = vmatprep.subr.bf16.mxu1 %v1589_v57 }
  0xc9   : > { %728 = vmatpush2.bf16.msra.mxu0 %v1591_v58 }
  0xca   : > { %977 = vmatpush2.bf16.msra.mxu1 %v1592_v59  ;;  %729 = vmatprep.subr.bf16.mxu0 %v1593_v60 }
  0xcb   : > { %978 = vmatprep.subr.bf16.mxu1 %v1595_v61 }
  0xcd   : > { %730 = vmatpush2.bf16.msra.mxu0 %v1597_v62 }
  0xce   : > { %979 = vmatpush2.bf16.msra.mxu1 %v1598_v63 }
 0x12d   : > { %v455_v40 = vpop.xlane.xlu0 %454 }
 0x12e   : > { %v459_v41 = vmul.f32 0.00390625, %v455_v40 }
 0x130   : > { %v2328_v42 = vsub.f32 %v2279_v0, %v459_v41  ;;  %v2331_v43 = vsub.f32 %v2281_v1, %v459_v41  ;;  %v1599_v0 = vld [vmem:[%s2273_s28 + $0xc4] ss:$8 sps:$4 sm:$0xff]  }
 0x131   : > { %v458_v44 = vpop.xlane.xlu0 %457  ;;  %v1601_v1 = vld [vmem:[%s2293_s14 + $0xc4] ss:$8 sps:$4 sm:$0xff]   ;;  %731 = vmatprep.subr.bf16.mxu0 %v1599_v0  ;;  %s2586_s14 = sld [smem:[#allocation38_spill]] }
 0x132   : > { %v460_v45 = vmul.f32 0.00390625, %v458_v44  ;;  %v465_v46 = vmul.f32 %v2328_v42, %v2328_v42  ;;  %v466_v47 = vmul.f32 %v2331_v43, %v2331_v43  ;;  %980 = vmatprep.subr.bf16.mxu1 %v1601_v1 }
 0x133   : > { %981 = vmatpush2.bf16.msra.mxu1 %v1604_v3 }
 0x134   : > { %v2338_v48 = vsub.f32 %v2283_v2, %v460_v45  ;;  %v2341_v49 = vsub.f32 %v2287_v4, %v460_v45  ;;  %v469_v50 = vadd.f32 %v466_v47, %v465_v46  ;;  %v1603_v2 = vld [vmem:[%s2273_s28 + $0xc0] ss:$8 sps:$4 sm:$0xff]   ;;  %v1605_v4 = vld [vmem:[%s2273_s28 + $0xb4] ss:$8 sps:$4 sm:$0xff]   ;;  %982 = vmatprep.subr.bf16.mxu1 %v1607_v5 }
 0x135   : > { %732 = vmatpush2.bf16.msra.mxu0 %v1603_v2 }
 0x136   : > { %470 = vadd.xlane.f32.xlu1 %v469_v50  ;;  %v467_v51 = vmul.f32 %v2338_v48, %v2338_v48  ;;  %v468_v52 = vmul.f32 %v2341_v49, %v2341_v49  ;;  %733 = vmatprep.subr.bf16.mxu0 %v1605_v4 }
 0x137   : > { %983 = vmatpush2.bf16.msra.mxu1 %v1610_v7  ;;  %s2403_s15 = scalar_lea.hbm %s2586_s14, %s1361_s3 }
 0x138   : > { %v472_v53 = vadd.f32 %v468_v52, %v467_v51  ;;  %984 = vmatprep.subr.bf16.mxu1 %v1613_v9 }
 0x139   : > { %734 = vmatpush2.bf16.msra.mxu0 %v1609_v6 }
 0x13a   : > { %473 = vadd.xlane.f32.xlu1 %v472_v53  ;;  %735 = vmatprep.subr.bf16.mxu0 %v1611_v8 }
 0x13b   : > { %985 = vmatpush2.bf16.msra.mxu1 %v1616_v11 }
 0x13c   : > { %986 = vmatprep.subr.bf16.mxu1 %v1619_v13 }
 0x13d   : > { %736 = vmatpush2.bf16.msra.mxu0 %v1615_v10 }
 0x13e   : > { %737 = vmatprep.subr.bf16.mxu0 %v1617_v12 }
 0x13f   : > { %987 = vmatpush2.bf16.msra.mxu1 %v1622_v15 }
 0x140   : > { %988 = vmatprep.subr.bf16.mxu1 %v1625_v17 }
 0x141   : > { %738 = vmatpush2.bf16.msra.mxu0 %v1621_v14 }
 0x142   : > { %739 = vmatprep.subr.bf16.mxu0 %v1623_v16 }
 0x143   : > { %989 = vmatpush2.bf16.msra.mxu1 %v1628_v19 }
 0x145   : > { %740 = vmatpush2.bf16.msra.mxu0 %v1627_v18 }
 0x1bf   : > { %v471_v20 = vpop.xlane.xlu1 %470 }
 0x1c0   : > { %v475_v21 = vmul.f32 0.00390625, %v471_v20 }
 0x1c2   : > { %v477_v22 = vadd.f32 1e-05, %v475_v21 }
 0x1c3   : > { %v474_v23 = vpop.xlane.xlu1 %473 }
 0x1c4   : > { %1629 = vrsqrt.f32 %v477_v22  ;;  %v476_v24 = vmul.f32 0.00390625, %v474_v23 }
 0x1c6   : > { %v478_v25 = vadd.f32 1e-05, %v476_v24 }
 0x1c8   : > { %1631 = vrsqrt.f32 %v478_v25 }
 0x1d1   : > { %v1630_v31 = vpop.eup %1629 }
 0x1d2   : > { %v482_v33 = vmul.f32 %v1630_v31, %v2331_v43  ;;  %v481_v36 = vmul.f32 %v1630_v31, %v2328_v42 }
 0x1d4   : > { %v497_v41 = vmul.f32 %v493_v35, %v482_v33  ;;  %v496_v45 = vmul.f32 %v489_v34, %v481_v36 }
 0x1d5   : > { %v1632_v37 = vpop.eup %1631 }
 0x1d6   : > { %v484_v40 = vmul.f32 %v1632_v37, %v2341_v49  ;;  %v483_v44 = vmul.f32 %v1632_v37, %v2338_v48  ;;  %v512_v50 = vadd.f32 %v508_v39, %v497_v41  ;;  %v511_v51 = vadd.f32 %v504_v38, %v496_v45 }
 0x1d8   : > { %v499_v46 = vmul.f32 %v493_v35, %v484_v40  ;;  %v498_v47 = vmul.f32 %v489_v34, %v483_v44 }
 0x1da   : > { %v514_v43 = vadd.f32 %v508_v39, %v499_v46  ;;  %v513_v52 = vadd.f32 %v504_v38, %v498_v47 }
 0x1dc   : > { %v516_v53 = vpack.c.bf16 %v514_v43, %v512_v50  ;;  %v515_v42 = vpack.c.bf16 %v513_v52, %v511_v51 }
 0x1de   : > { %741 = vmatprep.mubr.bf16.mxu0 %v516_v53  ;;  %990 = vmatprep.mubr.bf16.mxu1 %v516_v53 }
 0x1df   : > { %742 = vmatmul.mubr.bf16.vlgmr.msra.gmra.mxu0 %v515_v42  ;;  %991 = vmatmul.mubr.bf16.vlgmr.msra.gmra.mxu1 %v515_v42 }
 0x29f   : > { %v743_v48 = vpop.f32.mrf.mxu0  ;;  %v992_v49 = vpop.f32.mrf.mxu1 }
 0x2a1   : > { %v745_v54 = vpop.f32.mrf.mxu0  ;;  %v994_v55 = vpop.f32.mrf.mxu1 }
 0x2a2   : > { %v1372_v56 = vpack.c.bf16 %v745_v54, %v743_v48  ;;  %v1374_v57 = vpack.c.bf16 %v994_v55, %v992_v49 }
 0x2a3   : > { %v747_v58 = vpop.f32.mrf.mxu0  ;;  %v996_v59 = vpop.f32.mrf.mxu1 }
 0x2a4   : > { %764 = vst [vmem:[%s439_s6] sm:$0xff] %v1372_v56  ;;  %1013 = vst [vmem:[%s446_s19] sm:$0xff] %v1374_v57 }
 0x2a5   : > { %v749_v60 = vpop.f32.mrf.mxu0  ;;  %v998_v61 = vpop.f32.mrf.mxu1 }
 0x2a6   : > { %v1373_v62 = vpack.c.bf16 %v749_v60, %v747_v58  ;;  %v1375_v63 = vpack.c.bf16 %v998_v61, %v996_v59 }
 0x2a8   : > { %765 = vst [vmem:[%s439_s6 + $0x8] sm:$0xff] %v1373_v62  ;;  %1014 = vst [vmem:[%s446_s19 + $0x8] sm:$0xff] %v1375_v63 }
 0x2a9   : > { %1786 = shalt.err (!%p1783_p4)
}
 0x2aa   : > { %s1787_s6 = scalar_lea.hbm %s2396_s1, 256  ;;  %s1791_s16 = scalar_lea.hbm %s2585_s4, 1024 }
 0x2ab   : > { %p1788_p10 = scmp.ne.s32.totalorder %s2396_s1, %s1787_s6  ;;  %p1792_p1 = scmp.lt.s32.totalorder %s2396_s1, %s2585_s4 }
 0x2ac   : > { %p1793_p5 = scmp.lt.s32.totalorder %s1791_s16, %s1787_s6 }
 0x2ad   : > { %p1789_p7 = pnand %p1788_p10, %p2587_p8 }
 0x2ae   : > { %p1794_p13 = por %p1793_p5, %p1792_p1 }
 0x2af   : > { %p1790_p0 = pneg %p1789_p7 }
 0x2b1   : > { %p1795_p6 = pnand %p1794_p13, %p1790_p0 }
 0x2b3   : > { %1798 = shalt.err (!%p1795_p6)
}
 0x2b4   : > { %s1967_s28 = smov 128   ;;  %s1968_s7 = smov 8  }
 0x2b5   : > { %1386 = dma.vmem_to_hbm [thread:$0]  (%p2587_p8), %s2391_s13, 256, %s2396_s1, %s1016_s30, %s1967_s28, %s1967_s28, %s1968_s7  }
 0x2b6   : > { %s1021_s17 = scalar_lea.sflag [#allocation13], %s2386_s5  ;;  %s1799_s12 = scalar_lea.vmem %s2398_s20, 256 }
 0x2b7   : > { %p1800_p12 = scmp.ne.s32.totalorder %s2398_s20, %s1799_s12  ;;  %s1969_s25 = smov [#allocation12]  }
 0x2b8   : > { %s1803_s6 = sshll.u32 %s1969_s25, 4  ;;  %s1804_s6 = int_to_ptr.vmem [resolvable:$false] %s1803_s6 }
 0x2b9   : > { %p1801_p11 = pnand %p1800_p12, %p2587_p8  ;;  %s1805_s3 = scalar_lea.vmem %s1804_s6, 512 }
 0x2ba   : > { %p1806_p2 = scmp.lt.s32.totalorder %s2398_s20, %s1804_s6  ;;  %p1807_p9 = scmp.lt.s32.totalorder %s1805_s3, %s1799_s12 }
 0x2bb   : > { %p1802_p3 = pneg %p1801_p11 }
 0x2bc   : > { %p1808_p4 = por %p1807_p9, %p1806_p2 }
 0x2be   : > { %p1809_p10 = pnand %p1808_p4, %p1802_p3 }
 0x2c0   : > { %1812 = shalt.err (!%p1809_p10)
}
 0x2c1   : > { %s1813_s13 = scalar_lea.hbm %s2403_s15, 256  ;;  %s1817_s30 = scalar_lea.hbm %s2586_s14, 1024 }
 0x2c2   : > { %p1814_p7 = scmp.ne.s32.totalorder %s2403_s15, %s1813_s13  ;;  %p1818_p5 = scmp.lt.s32.totalorder %s2403_s15, %s2586_s14 }
 0x2c3   : > { %p1819_p13 = scmp.lt.s32.totalorder %s1817_s30, %s1813_s13 }
 0x2c4   : > { %p1815_p0 = pnand %p1814_p7, %p2587_p8 }
 0x2c5   : > { %p1820_p6 = por %p1819_p13, %p1818_p5 }
 0x2c6   : > { %p1816_p1 = pneg %p1815_p0 }
 0x2c8   : > { %p1821_p12 = pnand %p1820_p6, %p1816_p1 }
 0x2ca   : > { %1824 = shalt.err (!%p1821_p12)
}
 0x2cb   : > { %1387 = dma.vmem_to_hbm [thread:$0]  (%p2587_p8), %s2398_s20, 256, %s2403_s15, %s1021_s17, %s1967_s28, %s1967_s28, %s1968_s7  }
 0x2cc PF: > { %p1414_p11 = scmp.ge.s32.totalorder %s1955_s10, 2  ;;  %s1069_s24 = sand.u32 1, %s1903_s21  }
 0x2cd   : > { %p2588_p3 = scmp.ne.s32.totalorder %s2568_s9, 0  ;;  %s1070_s2 = scalar_lea.sflag [#allocation4], %s1069_s24 }
 0x2cf   : > { %p1407_p2 = pnand %p1414_p11, %p2588_p3 }
 0x2d1   : > { %p1408_p9 = pneg %p1407_p2 }
 0x2d3   : > { %1894 = dma.done.wait (%p1408_p9), %s1070_s2, 256  }
 0x2d4   : > { %1896 = vsyncadd (%p1408_p9), %s1070_s2, 4294967040  ;;  %s1079_s12 = scalar_lea.sflag [#allocation13], %s1069_s24 }
 0x2d5   : > { %1898 = dma.done.wait (%p1408_p9), %s1079_s12, 256  }
 0x2d6   : > { %1900 = vsyncadd (%p1408_p9), %s1079_s12, 4294967040  ;;  %s32_s10 = sadd.s32 1, %s1955_s10   ;;  %s2590_s24 = sld [smem:[#allocation19_spill]] }
 0x2d7   : > { %p2460_p4 = scmp.ge.s32.totalorder %s32_s10, 6   ;;  %s2591_s9 = sld [smem:[#allocation20_spill]] }
 0x2d8   : > { %s2592_s20 = sld [smem:[#allocation31_spill]]  ;;  %s2596_s21 = smov %s1907_s22 }
 0x2d9   : > { %s2593_s7 = sld [smem:[#allocation23_spill]]  ;;  %s2597_s22 = smov %s1911_s23 }
 0x2da   : > { %s2594_s15 = sld [smem:[#allocation28_spill]]  ;;  %s2598_s23 = smov %s2205_s27 }
 0x2db   : > { %s2595_s17 = sld [smem:[#allocation30_spill]]  ;;  %s2599_s25 = smov %s1923_s26 }
 0x2dc   : > { %s2600_s26 = smov %s2202_s18  ;;  %s2602_s28 = smov %s1935_s29 }
 0x2dd   : > { %s2601_s27 = smov %s2591_s9  ;;  %s2604_s30 = smov %s1947_s8 }
 0x2de   : > { %s2603_s29 = smov %s2592_s20  ;;  %31 = sbr.rel (!%p2460_p4) target bundleno = 23 (0x17), region = 150 }
 0x2e0   : > { %s2605_s8 = smov %s2594_s15 }
 0x2e1   : > { %s2606_s9 = smov %s2595_s17 }
 0x2e3   :  { %1084 = vsyncpa [#allocation3], 1 }
 0x2e4   :  { %1086 = vsyncpa [#allocation3 + $0x1], 1 }
 0x2e5   :  { %1087 = vsyncpa [#allocation6], 1 }
 0x2e6   :  { %1089 = vsyncpa [#allocation6 + $0x1], 1 }
 0x2e7   :  { %1090 = vsyncpa [#allocation9], 1 }
 0x2e8   :  { %1092 = vsyncpa [#allocation9 + $0x1], 1 }
 0x2e9   :  { %1093 = vsyncpa [#allocation4], 1 }
 0x2ea   :  { %1095 = vsyncpa [#allocation4 + $0x1], 1 }
 0x2eb   :  { %1096 = vsyncpa [#allocation13], 1 }
 0x2ec   :  { %1098 = vsyncpa [#allocation13 + $0x1], 1 }

</bundles_post_ra>
